<compile_context>
chip_gen: v7x
topology: tpu7x:2x2x1
jax: 0.10.0
libtpu: 0.0.40
codegen_flags: <defaults>
</compile_context>

<pallas_src>
import jax
import jax.numpy as jnp
from jax.experimental import pallas as pl
from jax.experimental.pallas import tpu as pltpu

IN_FEATURES = 28 * 28  # 784
OUT_FEATURES = 1


def _round_up(x: int, m: int) -> int:
    return ((x + m - 1) // m) * m


def _cdiv(a: int, b: int) -> int:
    return -(-a // b)


def _dummy_model_kernel(x1_ref, x2_ref, w_ref, b_ref, o_ref):
    # x1_ref, x2_ref: (TB, 784) VMEM (input dtype)   w_ref: (1, 784) f32, resident
    # b_ref: (1,) SMEM scalar                        o_ref: (TB, 1) f32
    diff = x1_ref[...].astype(jnp.float32) - x2_ref[...].astype(jnp.float32)
    # VPU multiply + XLU lane reduction (replaces the N=1 MXU matvec).
    logits = jnp.sum(diff * w_ref[...], axis=-1, keepdims=True)      # (TB, 1)
    logits = logits + b_ref[0]                                       # SMEM scalar bias
    o_ref[...] = jax.nn.sigmoid(logits).astype(o_ref.dtype)


def dummy_model_forward(x1, x2, weight, bias, *, tb: int = 2048):
    """x1, x2: (B, 1, 28, 28) float32 or bfloat16.  weight: (1, 784).  bias: (1,).

    Returns sigmoid((x1 - x2).reshape(B, -1) @ weight.T + bias), shape (B, 1) f32.
    """
    b = x1.shape[0]
    x1_flat = x1.reshape(b, -1)                      # cheap reshape, no HBM pass
    x2_flat = x2.reshape(b, -1)
    w = weight.astype(jnp.float32)                   # (1, 784) lane-dense
    bias1d = bias.astype(jnp.float32).reshape(OUT_FEATURES)

    # --- Batch tile selection (no padding of the data). ------------------
    # Sublane granularity depends on input dtype (f32 -> 8, bf16 -> 16).
    itemsize = jnp.dtype(x1_flat.dtype).itemsize
    sub = {4: 8, 2: 16, 1: 32}.get(itemsize, 8)
    # Cap the tile so the grid has >= 2 tiles when the batch allows it
    # (lets v7x shard the "parallel" axis across its two TensorCores).
    tb_eff = min(tb, _round_up(_cdiv(b, 2), sub))
    if tb_eff > b:
        tb_eff = b        # single block equal to the full batch dim -> always legal
    num_tiles = _cdiv(b, tb_eff)

    # --- VMEM budget from the *padded* layout. ----------------------------
    lanes_in = _round_up(IN_FEATURES, 128)           # 784 -> 896 lanes
    lanes_out = 128                                  # (TB, 1) output pads to 128 lanes
    footprint = (
        2 * 2 * tb_eff * lanes_in * itemsize         # two inputs, double-buffered
        + 2 * tb_eff * lanes_out * 4                 # f32 output, double-buffered
        + 2 * 8 * lanes_in * 4                       # resident (1,784) weight tile
    )
    vmem_limit = int(footprint) + (8 << 20)          # headroom for internal scratch

    out = pl.pallas_call(
        _dummy_model_kernel,
        out_shape=jax.ShapeDtypeStruct((b, OUT_FEATURES), jnp.float32),
        grid_spec=pltpu.PrefetchScalarGridSpec(
            num_scalar_prefetch=0,
            grid=(num_tiles,),
            in_specs=[
                # Batch-tiled activations: pipelined / double-buffered; the
                # last block may be ragged (masked write-back, rows independent).
                pl.BlockSpec((tb_eff, IN_FEATURES), lambda i: (i, 0)),
                pl.BlockSpec((tb_eff, IN_FEATURES), lambda i: (i, 0)),
                # Lane-dense weight row, constant index map -> stays resident.
                pl.BlockSpec((OUT_FEATURES, IN_FEATURES), lambda i: (0, 0)),
                # Bias as an SMEM scalar (no VMEM tile, no extra DMA stream).
                pl.BlockSpec(memory_space=pltpu.MemorySpace.SMEM),
            ],
            out_specs=pl.BlockSpec((tb_eff, OUT_FEATURES), lambda i: (i, 0)),
        ),
        compiler_params=pltpu.CompilerParams(
            # Batch tiles are independent -> megacore-shardable on v7x.
            dimension_semantics=("parallel",),
            vmem_limit_bytes=vmem_limit,
        ),
    )(x1_flat, x2_flat, w, bias1d)

    return out


if __name__ == "__main__":
    key = jax.random.PRNGKey(0)
    k_x1, k_x2, k_w, k_b = jax.random.split(key, 4)

    # Deterministic parameters mimicking nn.Linear default init:
    # uniform(-1/sqrt(fan_in), 1/sqrt(fan_in)).
    bound = 1.0 / (IN_FEATURES ** 0.5)
    weight = jax.random.uniform(k_w, (OUT_FEATURES, IN_FEATURES),
                                minval=-bound, maxval=bound, dtype=jnp.float32)
    bias = jax.random.uniform(k_b, (OUT_FEATURES,),
                              minval=-bound, maxval=bound, dtype=jnp.float32)

    # --- Small canonical case: batch=2, NCHW MNIST-like inputs. ---
    batch = 2
    x1 = jax.random.normal(k_x1, (batch, 1, 28, 28), dtype=jnp.float32)
    x2 = jax.random.normal(k_x2, (batch, 1, 28, 28), dtype=jnp.float32)

    out = jax.block_until_ready(dummy_model_forward(x1, x2, weight, bias))
    ref = jax.nn.sigmoid(
        (x1.reshape(batch, -1) - x2.reshape(batch, -1)) @ weight.T + bias)
    assert out.shape == (batch, 1)
    assert jnp.allclose(out, ref, atol=1e-5, rtol=1e-5)

    # --- Exercise the multi-tile + ragged-last-block path:
    #     batch=20 with tb=8 -> grid of 3 tiles, last tile has 4 valid rows. ---
    b2 = 20
    x1b = jax.random.normal(k_x1, (b2, 1, 28, 28), dtype=jnp.float32)
    x2b = jax.random.normal(k_x2, (b2, 1, 28, 28), dtype=jnp.float32)
    out2 = jax.block_until_ready(
        dummy_model_forward(x1b, x2b, weight, bias, tb=8))
    ref2 = jax.nn.sigmoid(
        (x1b.reshape(b2, -1) - x2b.reshape(b2, -1)) @ weight.T + bias)
    assert out2.shape == (b2, 1)
    assert jnp.allclose(out2, ref2, atol=1e-5, rtol=1e-5)
    assert not jnp.any(jnp.isnan(out2))

    print("KERNEL_OK")
</pallas_src>

<mosaic_0001>
module attributes {stable_mosaic.version = 11 : i64} {
  func.func @_dummy_model_kernel(%arg0: i32, %arg1: memref<2x784xf32, #tpu.memory_space<vmem>>, %arg2: memref<2x784xf32, #tpu.memory_space<vmem>>, %arg3: memref<1x784xf32, #tpu.memory_space<vmem>>, %arg4: memref<1xf32, #tpu.memory_space<smem>>, %arg5: memref<2x1xf32, #tpu.memory_space<vmem>>) attributes {dimension_semantics = [#tpu.dimension_semantics<parallel>], iteration_bounds = array<i64: 1>, scalar_prefetch = 0 : i64, scratch_operands = 0 : i64, tpu.core_type = #tpu.core_type<tc>, window_params = [{transform_indices = @transform_0, window_bounds = array<i64: 2, 784>}, {transform_indices = @transform_1, window_bounds = array<i64: 2, 784>}, {pipeline_mode = #tpu.pipeline_mode<synchronous>, transform_indices = @transform_2, window_bounds = array<i64: 1, 784>}, {transform_indices = @transform_3, window_bounds = array<i64: 1>}, {transform_indices = @transform_4, window_bounds = array<i64: 2, 1>}]} {
    %c0 = arith.constant 0 : index
    %c0_0 = arith.constant 0 : index
    %0 = vector.load %arg1[%c0, %c0_0] : memref<2x784xf32, #tpu.memory_space<vmem>>, vector<2x784xf32>
    %c0_1 = arith.constant 0 : index
    %c0_2 = arith.constant 0 : index
    %1 = vector.load %arg2[%c0_1, %c0_2] : memref<2x784xf32, #tpu.memory_space<vmem>>, vector<2x784xf32>
    %2 = arith.subf %0, %1 : vector<2x784xf32>
    %c0_3 = arith.constant 0 : index
    %c0_4 = arith.constant 0 : index
    %3 = vector.load %arg3[%c0_3, %c0_4] : memref<1x784xf32, #tpu.memory_space<vmem>>, vector<1x784xf32>
    %4 = vector.broadcast %3 : vector<1x784xf32> to vector<2x784xf32>
    %5 = arith.mulf %2, %4 : vector<2x784xf32>
    %cst = arith.constant dense<0.000000e+00> : vector<2xf32>
    %6 = vector.multi_reduction <add>, %5, %cst [1] : vector<2x784xf32> to vector<2xf32>
    %7 = vector.shape_cast %6 : vector<2xf32> to vector<2x1xf32>
    %c0_5 = arith.constant 0 : index
    %8 = memref.load %arg4[%c0_5] : memref<1xf32, #tpu.memory_space<smem>>
    %9 = vector.broadcast %8 : f32 to vector<2x1xf32>
    %10 = arith.addf %7, %9 : vector<2x1xf32>
    %11 = arith.negf %10 : vector<2x1xf32>
    %12 = math.exp %11 : vector<2x1xf32>
    %cst_6 = arith.constant 1.000000e+00 : f32
    %13 = vector.broadcast %cst_6 : f32 to vector<2x1xf32>
    %14 = arith.addf %13, %12 : vector<2x1xf32>
    %15 = arith.divf %13, %14 : vector<2x1xf32>
    %c0_7 = arith.constant 0 : index
    %c0_8 = arith.constant 0 : index
    %16 = vector.load %arg5[%c0_7, %c0_8] : memref<2x1xf32, #tpu.memory_space<vmem>>, vector<2x1xf32>
    tpu.vector_store %arg5[%c0_7, %c0_8], %15 {strides = array<i32>} : memref<2x1xf32, #tpu.memory_space<vmem>>, vector<2x1xf32>,
    return
  }
  func.func @transform_0(%arg0: i32) -> (i32, i32) {
    %c0_i32 = arith.constant 0 : i32
    %c0_i32_0 = arith.constant 0 : i32
    return %arg0, %c0_i32 : i32, i32
  }
  func.func @transform_1(%arg0: i32) -> (i32, i32) {
    %c0_i32 = arith.constant 0 : i32
    %c0_i32_0 = arith.constant 0 : i32
    return %arg0, %c0_i32 : i32, i32
  }
  func.func @transform_2(%arg0: i32) -> (i32, i32) {
    %c0_i32 = arith.constant 0 : i32
    %c0_i32_0 = arith.constant 0 : i32
    %c0_i32_1 = arith.constant 0 : i32
    return %c0_i32, %c0_i32_0 : i32, i32
  }
  func.func @transform_3(%arg0: i32) -> i32 {
    %c0_i32 = arith.constant 0 : i32
    %c0_i32_0 = arith.constant 0 : i32
    return %c0_i32 : i32
  }
  func.func @transform_4(%arg0: i32) -> (i32, i32) {
    %c0_i32 = arith.constant 0 : i32
    %c0_i32_0 = arith.constant 0 : i32
    return %arg0, %c0_i32 : i32, i32
  }
}

</mosaic_0001>

<bundles_post_ra>
// kernel: tpu_custom_call.1
= control target key start
LH: loop header
LB: loop body
LE: loop exit
PB: predicated region body
PF: predicated region fallthrough
CT: control target
= control target key end

     0   :  { %10 = vsyncpa [#allocation4], 0  ;;  %s314_s0 = inlined_call_operand.hbm [shape: f32[2,784], index: 0, kind: input, shape index: {}]   ;;  %s315_s1 = inlined_call_operand.hbm [shape: f32[2,784], index: 1, kind: input, shape index: {}]   ;;  %s316_s2 = inlined_call_operand.vmem [shape: f32[1,784], index: 2, kind: input, shape index: {}]   ;;  %s317_s3 = inlined_call_operand.<no memory space> [shape: f32[1], index: 3, kind: input, shape index: {}]   ;;  %s318_s4 = inlined_call_operand.vmem [shape: f32[2,1], index: 4, kind: output, shape index: {}]  }
   0x1   :  { %11 = vsyncpa [#allocation6], 0  ;;  %s247_s15 = smov [#allocation3]   ;;  %s248_s17 = smov [#allocation5]  }
   0x2   :  { %s18_s16 = sshll.u32 %s247_s15, 4  ;;  %s28_s18 = sshll.u32 %s248_s17, 4  ;;  %s19_s16 = int_to_ptr.vmem [resolvable:$true] %s18_s16  ;;  %s29_s18 = int_to_ptr.vmem [resolvable:$true] %s28_s18 }
   0x3   :  { %s199_s21 = scalar_lea.hbm %s314_s0, 224 }
   0x4   :  { %p200_p0 = scmp.ne.s32.totalorder %s314_s0, %s199_s21  ;;  %p203_p1 = scmp.lt.u32.totalorder %s199_s21, %s314_s0 }
   0x6   :  { %p205_p2 = pnand %p203_p1, %p200_p0 }
   0x8   :  { %208 = shalt.err (!%p205_p2)
}
   0x9   :  { %s209_s26 = scalar_lea.vmem %s19_s16, 224  ;;  %p214_p4 = scmp.lt.s32.totalorder %s19_s16, %s19_s16 }
   0xa   :  { %p210_p3 = scmp.ne.s32.totalorder %s19_s16, %s209_s26  ;;  %p215_p5 = scmp.lt.s32.totalorder %s209_s26, %s209_s26 }
   0xc   :  { %p216_p6 = por %p215_p5, %p214_p4 }
   0xe   :  { %p217_p7 = pnand %p216_p6, %p210_p3 }
  0x10   :  { %220 = shalt.err (!%p217_p7)
}
  0x11   :  { %21 = dma.hbm_to_vmem [thread:$0]  %s314_s0, 224, %s19_s16, [#allocation4]  }
  0x12   :  { %s221_s5 = scalar_lea.hbm %s315_s1, 224 }
  0x13   :  { %p222_p8 = scmp.ne.s32.totalorder %s315_s1, %s221_s5  ;;  %p225_p9 = scmp.lt.u32.totalorder %s221_s5, %s315_s1 }
  0x15   :  { %p227_p10 = pnand %p225_p9, %p222_p8 }
  0x17   :  { %230 = shalt.err (!%p227_p10)
}
  0x18   :  { %s231_s10 = scalar_lea.vmem %s29_s18, 224  ;;  %p236_p12 = scmp.lt.s32.totalorder %s29_s18, %s29_s18 }
  0x19   :  { %p232_p11 = scmp.ne.s32.totalorder %s29_s18, %s231_s10  ;;  %p237_p13 = scmp.lt.s32.totalorder %s231_s10, %s231_s10 }
  0x1b   :  { %p238_p0 = por %p237_p13, %p236_p12 }
  0x1d   :  { %p239_p1 = pnand %p238_p0, %p232_p11 }
  0x1f   :  { %242 = shalt.err (!%p239_p1)
}
  0x20   :  { %31 = dma.hbm_to_vmem [thread:$0]  %s315_s1, 224, %s29_s18, [#allocation6]  }
  0x21   :  { %243 = dma.done.wait [#allocation4], 224  }
  0x22   :  { %244 = vsyncadd [#allocation4], 4294967072 }
  0x23   :  { %245 = dma.done.wait [#allocation6], 224  }
  0x24   :  { %246 = vsyncadd [#allocation6], 4294967072  ;;  %v50_v0 = vlaneseq  ;;  %v249_v1 = vmov 1983009808   ;;  %v48_v12 = vld [vmem:[%s316_s2] sm:$0x7f]  ;;  %v175_v60 = vstv %s317_s3 }
  0x25   :  { %v81_v2 = vunpack.c.l.s4 %v249_v1  ;;  %v42_v17 = vld [vmem:[#allocation3] sm:$0xff]  ;;  %v43_v22 = vld [vmem:[#allocation3 + $0x8] sm:$0x3f]  ;;  %v44_v23 = vld [vmem:[#allocation5] sm:$0xff]  ;;  %vm157_vm0 = vcmask 1041408   ;;  %vm169_vm1 = vcmask 123904  }
  0x26   :  { %v51_v3 = vshrl.u32 %v50_v0, 7  ;;  %v45_v24 = vld [vmem:[#allocation5 + $0x8] sm:$0x3f]  ;;  %v46_v30 = vsub.f32 %v42_v17, %v44_v23  ;;  %vm183_vm2 = vcmask 1024  }
  0x27   :  { %v82_v7 = vunpack.c.0.s8 %v81_v2  ;;  %v47_v31 = vsub.f32 %v43_v22, %v45_v24 }
  0x28   :  { %v52_v4 = vsub.s32 0, %v51_v3  ;;  %v56_v5 = vsub.s32 1, %v51_v3  ;;  %v60_v6 = vsub.s32 2, %v51_v3  ;;  %v64_v8 = vsub.s32 3, %v51_v3 }
  0x29   :  { %v68_v9 = vsub.s32 4, %v51_v3  ;;  %v72_v10 = vsub.s32 5, %v51_v3  ;;  %v76_v11 = vsub.s32 6, %v51_v3  ;;  %v85_v16 = vsub.s32 %v82_v7, %v51_v3 }
  0x2a   :  { %v53_v13 = vrot.slane %v48_v12, %v52_v4  ;;  %v57_v14 = vrot.slane %v48_v12, %v56_v5  ;;  %v61_v15 = vrot.slane %v48_v12, %v60_v6  ;;  %v65_v18 = vrot.slane %v48_v12, %v64_v8 }
  0x2b   :  { %v69_v19 = vrot.slane %v48_v12, %v68_v9  ;;  %v73_v20 = vrot.slane %v48_v12, %v72_v10  ;;  %v77_v21 = vrot.slane %v48_v12, %v76_v11 }
  0x2c   :  { %v78_v25 = vcombine.low %v53_v13, %v57_v14  ;;  %v79_v26 = vcombine.low %v61_v15, %v65_v18 }
  0x2d   :  { %v95_v27 = vcombine.low %v69_v19, %v73_v20  ;;  %v109_v28 = vrot.slane %v77_v21, %v85_v16 }
  0x2e   :  { %v86_v29 = vrot.slane %v78_v25, %v85_v16  ;;  %v93_v32 = vrot.slane %v79_v26, %v85_v16 }
  0x2f   :  { %v102_v33 = vrot.slane %v95_v27, %v85_v16 }
  0x30   :  { %v94_v34 = vcombine.low %v86_v29, %v93_v32 }
  0x31   :  { %v110_v35 = vcombine.low %v102_v33, %v109_v28 }
  0x32   :  { %v113_v36 = vmul.f32 %v94_v34, %v46_v30 }
  0x33   :  { %v114_v37 = vmul.f32 %v110_v35, %v47_v31 }
  0x34   :  { %v117_v38 = vcombine.high %v113_v36, %v113_v36  ;;  %v124_v39 = vrot.slane %v113_v36, %v85_v16 }
  0x35   :  { %v141_v42 = vrot.slane %v114_v37, %v85_v16  ;;  %v134_v45 = vcombine.high %v114_v37, %v114_v37 }
  0x36   :  { %v131_v40 = vrot.slane %v117_v38, %v85_v16  ;;  %v132_v41 = vcombine.high %v124_v39, %v124_v39  ;;  %v158_v43 = vsel %vm157_vm0, %v124_v39, 0.0 }
  0x37   :  { %v149_v49 = vcombine.high %v141_v42, %v141_v42  ;;  %v148_v52 = vrot.slane %v134_v45, %v85_v16  ;;  %v165_v53 = vsel %vm157_vm0, %v141_v42, 0.0 }
  0x38   :  { %v133_v44 = vcombine.high %v131_v40, %v131_v40  ;;  %v159_v46 = vsel %vm157_vm0, %v132_v41, 0.0  ;;  %v161_v47 = vsel %vm157_vm0, %v131_v40, 0.0 }
  0x39   :  { %v160_v48 = vadd.f32 %v159_v46, %v158_v43  ;;  %v167_v55 = vsel %vm157_vm0, %v149_v49, 0.0  ;;  %v170_v57 = vsel %vm169_vm1, %v148_v52, 0.0 }
  0x3a   :  { %v163_v50 = vsel %vm157_vm0, %v133_v44, 0.0 }
  0x3b   :  { %v162_v51 = vadd.f32 %v161_v47, %v160_v48 }
  0x3d   :  { %v164_v54 = vadd.f32 %v163_v50, %v162_v51 }
  0x3f   :  { %v166_v56 = vadd.f32 %v165_v53, %v164_v54 }
  0x41   :  { %v168_v58 = vadd.f32 %v167_v55, %v166_v56 }
  0x43   :  { %v171_v59 = vadd.f32 %v170_v57, %v168_v58 }
  0x45   :  { %172 = vadd.xlane.f32.xlu0 %v171_v59 }
  0xd2   :  { %v173_v61 = vpop.xlane.xlu0 %172 }
  0xd3   :  { %v176_v62 = vadd.f32 %v175_v60, %v173_v61 }
  0xd5   :  { %v191_v63 = vmul.f32 -1.442695, %v176_v62 }
  0xd7   :  { %195 = vpow2.f32 %v191_v63 }
  0xe1   :  { %v196_v0 = vpop.eup %195 }
  0xe2   :  { %v180_v1 = vadd.f32 1.0, %v196_v0 }
  0xe4   :  { %197 = vrcp.f32 %v180_v1 }
  0xee   :  { %v198_v2 = vpop.eup %197 }
  0xef   :  { %184 = vst.msk [vmem:[%s318_s4] sm:$0x3] %vm183_vm2, %v198_v2 }
  0xf0   :  { %189 = vsyncpa [#allocation4], 1 }
  0xf1   :  { %190 = vsyncpa [#allocation6], 1 }

</bundles_post_ra>
